<compile_context>
chip_gen: v5e
topology: v5e:2x2
jax: 0.10.0
libtpu: 0.0.40
codegen_flags: <defaults>
</compile_context>

<pallas_src>
import math
import functools

import jax
import jax.numpy as jnp
from jax.experimental import pallas as pl
from jax.experimental.pallas import tpu as pltpu


_LANE = 128          # lane-dense output width
_SUBLANE = 8
_TILE_K = 512        # K chunk used only when the whole weight does not fit VMEM


def _round_up(x, m):
    return (x + m - 1) // m * m


def _cdiv(a, b):
    return (a + b - 1) // b


def _vmem_limits():
    """(tile budget, scoped vmem limit) in bytes, per chip generation."""
    try:
        cap = int(pltpu.get_tpu_info().vmem_capacity_bytes)
    except Exception:
        cap = 64 * 1024 * 1024                 # conservative: assume v7x (64 MiB/TC)
    vmem_limit = min(int(cap * 0.75), cap - (16 << 20))   # 48 MiB v7x, 96 MiB v5e/v6e
    tile_budget = vmem_limit - (12 << 20)                  # headroom for bookkeeping
    return tile_budget, vmem_limit


def _k_plan(in_dim, out_dim, compute_dtype):
    """Decide whether K is tiled, based on the actual weight footprint."""
    wbytes = jnp.dtype(compute_dtype).itemsize
    out_p = _round_up(out_dim, _LANE)
    budget, _ = _vmem_limits()
    # Keep K whole while the (conservatively double-buffered) weight leaves at
    # least half the budget for activation / output tiles.
    if 2 * in_dim * out_p * wbytes <= budget // 2:
        tile_k, in_p = in_dim, in_dim
    else:
        tile_k = _TILE_K
        in_p = _round_up(in_dim, tile_k)
    return tile_k, in_p, out_p, in_p // tile_k


def _pick_tile_rows(n_rows, tile_k, num_k, out_p, xbytes, wbytes, obytes, pack,
                    budget):
    """Largest row tile fitting the budget, capped so num_i >= 2 (v7x megacore)."""
    if n_rows <= pack:
        return n_rows                            # single full-extent block
    cap_rows = _round_up(_cdiv(n_rows, 2), pack)  # >= 2 row tiles
    for tr in (2048, 1024, 512, 256, 128, 64, 32, 16, 8):
        if tr < pack or tr > cap_rows:
            continue
        need = (2 * tr * tile_k * xbytes          # x tile, double-buffered
                + 2 * tile_k * out_p * wbytes     # weight tile (conservative 2x)
                + 2 * tr * out_p * obytes)        # output tile, double-buffered
        if num_k > 1:
            need += tr * out_p * 4                # f32 accumulator scratch
        if need <= budget:
            return tr
    return pack


def _linear_kernel(x_ref, w_ref, o_ref):
    """K untiled: cast x on the VPU, one MXU dot, lane-dense store. No scratch."""
    o_ref[...] = jnp.dot(
        x_ref[...].astype(w_ref.dtype), w_ref[...],
        preferred_element_type=jnp.float32,
    ).astype(o_ref.dtype)


def _linear_kernel_ktiled(x_ref, w_ref, o_ref, acc_ref):
    """K tiled: f32 VMEM accumulator over the K grid axis."""
    @pl.when(pl.program_id(1) == 0)
    def _():
        acc_ref[...] = jnp.zeros_like(acc_ref)

    acc_ref[...] += jnp.dot(
        x_ref[...].astype(w_ref.dtype), w_ref[...],
        preferred_element_type=jnp.float32,
    )

    @pl.when(pl.program_id(1) == pl.num_programs(1) - 1)
    def _():
        o_ref[...] = acc_ref[...].astype(o_ref.dtype)


@functools.partial(jax.jit, static_argnames=("out_dim", "compute_dtype"))
def node_apply_forward(h, w_p, *, out_dim, compute_dtype=jnp.bfloat16):
    """h: [N, in_dim] node features; w_p: [in_p, out_p] pre-padded W^T."""
    N, in_dim = h.shape
    in_p, out_p = w_p.shape
    out_dtype = h.dtype

    tile_k, in_p_plan, out_p_plan, num_k = _k_plan(in_dim, out_dim, compute_dtype)
    assert (in_p_plan, out_p_plan) == (in_p, out_p), "weight padded with a different plan"

    xbytes = jnp.dtype(h.dtype).itemsize
    wbytes = jnp.dtype(compute_dtype).itemsize
    obytes = jnp.dtype(out_dtype).itemsize
    budget, vmem_limit = _vmem_limits()
    pack = max(_SUBLANE, 32 // wbytes)            # bf16 -> 16, f32 -> 8

    tile_rows = _pick_tile_rows(N, tile_k, num_k, out_p,
                                xbytes, wbytes, obytes, pack, budget)
    num_i = _cdiv(N, tile_rows)

    # Zero-pad K only when K is actually tiled (needed for exact accumulation).
    # Rows are never padded: garbage in OOB tail rows is clipped on writeback.
    if num_k > 1 and in_p != in_dim:
        h_in = jnp.pad(h, ((0, 0), (0, in_p - in_dim)))
    else:
        h_in = h

    cost = pl.CostEstimate(
        flops=2 * N * in_dim * out_dim,
        transcendentals=0,
        bytes_accessed=(N * in_dim * xbytes
                        + in_p * out_p * wbytes
                        + N * out_p * obytes),
    )

    if num_k == 1:
        kernel, scratch = _linear_kernel, []
    else:
        kernel = _linear_kernel_ktiled
        scratch = [pltpu.VMEM((tile_rows, out_p), jnp.float32)]

    out_padded = pl.pallas_call(
        kernel,
        out_shape=jax.ShapeDtypeStruct((N, out_p), out_dtype),
        grid_spec=pltpu.PrefetchScalarGridSpec(
            num_scalar_prefetch=0,
            grid=(num_i, num_k),
            in_specs=[
                pl.BlockSpec((tile_rows, tile_k), lambda i, k: (i, k)),
                pl.BlockSpec((tile_k, out_p), lambda i, k: (k, 0)),
            ],
            out_specs=pl.BlockSpec((tile_rows, out_p), lambda i, k: (i, 0)),
            scratch_shapes=scratch,
        ),
        compiler_params=pltpu.CompilerParams(
            dimension_semantics=("parallel", "arbitrary"),
            vmem_limit_bytes=vmem_limit,
        ),
        cost_estimate=cost,
    )(h_in, w_p)

    if out_p != out_dim:
        return out_padded[:, :out_dim]
    return out_padded


class NodeApplyModule:
    """JAX/Pallas port of the PyTorch NodeApplyModule (nn.Linear, bias=False)."""

    def __init__(self, in_dim, out_dim, key, bias=False,
                 compute_dtype=jnp.bfloat16):
        assert not bias, "reference module is constructed with bias=False"
        # nn.Linear default init: U(-1/sqrt(in_dim), 1/sqrt(in_dim)), shape [out, in].
        bound = 1.0 / math.sqrt(in_dim)
        w = jax.random.uniform(
            key, (out_dim, in_dim), dtype=jnp.float32, minval=-bound, maxval=bound
        )
        # Hoisted per-call work: transpose + cast + zero-pad the weight ONCE.
        tile_k, in_p, out_p, _ = _k_plan(in_dim, out_dim, compute_dtype)
        w_t = jnp.asarray(w.T).astype(compute_dtype)          # [in_dim, out_dim]
        self.w_p = jnp.pad(w_t, ((0, in_p - in_dim), (0, out_p - out_dim)))
        self.out_dim = out_dim
        self.compute_dtype = compute_dtype

    def forward(self, node):
        h = node_apply_forward(node["data"]["h"], self.w_p,
                               out_dim=self.out_dim,
                               compute_dtype=self.compute_dtype)
        return {"h": h}


if __name__ == "__main__":
    key = jax.random.PRNGKey(0)
    k_w, k_h = jax.random.split(key)

    N, in_dim, out_dim = 128, 64, 32   # small graph: 128 nodes, 64 -> 32 features
    h_in = jax.random.normal(k_h, (N, in_dim), dtype=jnp.float32)
    node = {"data": {"h": h_in}}

    # Exact f32 path (matches nn.Linear semantics up to fp rounding).
    mod_f32 = NodeApplyModule(in_dim, out_dim, k_w, bias=False,
                              compute_dtype=jnp.float32)
    out_f32 = jax.block_until_ready(mod_f32.forward(node)["h"])
    w_t_f32 = mod_f32.w_p[:in_dim, :out_dim]      # un-padded f32 W^T for reference
    ref = h_in @ w_t_f32
    assert out_f32.shape == (N, out_dim)
    assert jnp.allclose(out_f32, ref, atol=1e-5, rtol=1e-5)

    # Default perf path: f32 h cast to bf16 in-kernel, f32 MXU accumulation.
    mod_bf16 = NodeApplyModule(in_dim, out_dim, k_w, bias=False)
    out_bf16 = jax.block_until_ready(mod_bf16.forward(node)["h"])
    assert out_bf16.shape == (N, out_dim)
    assert out_bf16.dtype == h_in.dtype
    assert jnp.allclose(out_bf16, ref, atol=3e-2, rtol=3e-2)

    print("KERNEL_OK")
</pallas_src>

<mosaic_0001>
module attributes {stable_mosaic.version = 11 : i64} {
  func.func @_linear_kernel(%arg0: i32, %arg1: i32, %arg2: memref<64x64xf32, #tpu.memory_space<vmem>>, %arg3: memref<64x128xf32, #tpu.memory_space<vmem>>, %arg4: memref<64x128xf32, #tpu.memory_space<vmem>>) attributes {dimension_semantics = [#tpu.dimension_semantics<parallel>, #tpu.dimension_semantics<arbitrary>], iteration_bounds = array<i64: 2, 1>, scalar_prefetch = 0 : i64, scratch_operands = 0 : i64, tpu.core_type = #tpu.core_type<tc>, window_params = [{transform_indices = @transform_0, window_bounds = array<i64: 64, 64>}, {transform_indices = @transform_1, window_bounds = array<i64: 64, 128>}, {transform_indices = @transform_2, window_bounds = array<i64: 64, 128>}]} {
    %c0 = arith.constant 0 : index
    %c0_0 = arith.constant 0 : index
    %0 = vector.load %arg2[%c0, %c0_0] : memref<64x64xf32, #tpu.memory_space<vmem>>, vector<64x64xf32>
    %c0_1 = arith.constant 0 : index
    %c0_2 = arith.constant 0 : index
    %1 = vector.load %arg3[%c0_1, %c0_2] : memref<64x128xf32, #tpu.memory_space<vmem>>, vector<64x128xf32>
    %cst = arith.constant dense<0.000000e+00> : vector<64x128xf32>
    %2 = tpu.matmul %0, %1, %cst {dimension_numbers = #tpu.dot_dimension_numbers<[1], [0], [0], [1], [0, 0, 1, 1], [], []>} : vector<64x64xf32>, vector<64x128xf32>, vector<64x128xf32> -> vector<64x128xf32>
    %c0_3 = arith.constant 0 : index
    %c0_4 = arith.constant 0 : index
    %3 = vector.load %arg4[%c0_3, %c0_4] : memref<64x128xf32, #tpu.memory_space<vmem>>, vector<64x128xf32>
    tpu.vector_store %arg4[%c0_3, %c0_4], %2 {strides = array<i32>} : memref<64x128xf32, #tpu.memory_space<vmem>>, vector<64x128xf32>,
    return
  }
  func.func @transform_0(%arg0: i32, %arg1: i32) -> (i32, i32) {
    %c0_i32 = arith.constant 0 : i32
    return %arg0, %arg1 : i32, i32
  }
  func.func @transform_1(%arg0: i32, %arg1: i32) -> (i32, i32) {
    %c0_i32 = arith.constant 0 : i32
    %c0_i32_0 = arith.constant 0 : i32
    return %arg1, %c0_i32 : i32, i32
  }
  func.func @transform_2(%arg0: i32, %arg1: i32) -> (i32, i32) {
    %c0_i32 = arith.constant 0 : i32
    %c0_i32_0 = arith.constant 0 : i32
    return %arg0, %c0_i32 : i32, i32
  }
}

</mosaic_0001>

<bundles_post_ra>
// kernel: node_apply_forward.1
= control target key start
LH: loop header
LB: loop body
LE: loop exit
PB: predicated region body
PF: predicated region fallthrough
CT: control target
= control target key end

     0   :  { %s472_s9 = smov 0   ;;  %s474_s10 = smov 0   ;;  %s544_s0 = inlined_call_operand.vmem [shape: f32[128,64], index: 0, kind: input, shape index: {}]   ;;  %s545_s1 = inlined_call_operand.vmem [shape: f32[64,128], index: 1, kind: input, shape index: {}]   ;;  %s546_s2 = inlined_call_operand.vmem [shape: f32[128,128], index: 2, kind: output, shape index: {}]  }
   0x1   :  { %s476_s11 = smov 0  }
   0x2 LB: > { %s24_s12 = sadd.s32 1, %s451_s10  ;;  %p370_p0 = scmp.ge.s32.totalorder %s455_s11, 1  ;;  %s455_s11 = sphi %s476_s11, %s12_s11   ;;  %s451_s10 = sphi %s474_s10, %s548_s10   ;;  %s447_s9 = sphi %s472_s9, %s547_s9  }
   0x3   : > { %p26_p1 = scmp.ge.s32.totalorder %s24_s12, 2  ;;  %p141_p2 = scmp.lt.s32.totalorder %s455_s11, 3 }
   0x5   : > { %s550_s12 = smov (%p26_p1, %s24_s12), 0  ;;  %p142_p3 = pnand %p370_p0, %p141_p2 }
   0x6   : > { %s371_s17 = sshll.u32 (!%p142_p3), %s447_s9, 3 }
   0x7   : > { %145 = sbr.rel (%p142_p3) target bundleno = 170 (0xaa), region = 28  ;;  %p172_p4 = scmp.lt.s32.totalorder (!%p142_p3), %s371_s17, 15 }
   0xc   : > { %v207_v0 = vld [vmem:[%s545_s1 + $0x38] sm:$0xff]  ;;  %v206_v1 = vld [vmem:[%s545_s1 + $0x30] sm:$0xff]  ;;  %v205_v2 = vld [vmem:[%s545_s1 + $0x28] sm:$0xff]  ;;  %s552_s17 = smov (!%p172_p4, %s371_s17), 15  ;;  %vm208_vm0 = vcmask 523264  }
   0xd   : > { %386 = vmatpush.msra.mxu2 %v207_v0  ;;  %387 = vmatpush.msra.mxu3 %v207_v0  ;;  %v204_v3 = vld [vmem:[%s545_s1 + $0x20] sm:$0xff]  ;;  %v203_v4 = vld [vmem:[%s545_s1 + $0x18] sm:$0xff]  ;;  %s372_s24 = sshll.u32 %s552_s17, 3  ;;  %v202_v5 = vld [vmem:[%s545_s1 + $0x10] sm:$0xff] }
   0xe   : > { %241 = vmatpush.msra.mxu0 %v207_v0  ;;  %385 = vmatpush.msra.mxu1 %v207_v0  ;;  %v201_v6 = vld [vmem:[%s545_s1 + $0x8] sm:$0xff]  ;;  %s178_s3 = scalar_lea.vmem %s544_s0, %s372_s24  ;;  %v200_v7 = vld [vmem:[%s545_s1] sm:$0xff]  ;;  %s190_s8 = scalar_lea.vmem %s546_s2, %s372_s24 }
   0xf   : > { %389 = vmatpush.msra.mxu2 %v206_v1  ;;  %390 = vmatpush.msra.mxu3 %v206_v1  ;;  %v196_v8 = vld [vmem:[%s178_s3 + $0x20] sm:$0xff]  ;;  %v198_v9 = vld [vmem:[%s178_s3 + $0x30] sm:$0xff]  ;;  %v197_v12 = vld [vmem:[%s178_s3 + $0x28] sm:$0xff] }
  0x10   : > { %242 = vmatpush.msra.mxu0 %v206_v1  ;;  %388 = vmatpush.msra.mxu1 %v206_v1  ;;  %v192_v10 = vld [vmem:[%s178_s3] sm:$0xff]  ;;  %v194_v11 = vld [vmem:[%s178_s3 + $0x10] sm:$0xff]  ;;  %v199_v13 = vld [vmem:[%s178_s3 + $0x38] sm:$0xff] }
  0x11   : > { %392 = vmatpush.msra.mxu2 %v205_v2  ;;  %393 = vmatpush.msra.mxu3 %v205_v2  ;;  %v193_v14 = vld [vmem:[%s178_s3 + $0x8] sm:$0xff]  ;;  %v195_v15 = vld [vmem:[%s178_s3 + $0x18] sm:$0xff] }
  0x12   : > { %243 = vmatpush.msra.mxu0 %v205_v2  ;;  %391 = vmatpush.msra.mxu1 %v205_v2 }
  0x13   : > { %395 = vmatpush.msra.mxu2 %v204_v3  ;;  %396 = vmatpush.msra.mxu3 %v204_v3 }
  0x14   : > { %244 = vmatpush.msra.mxu0 %v204_v3  ;;  %394 = vmatpush.msra.mxu1 %v204_v3 }
  0x15   : > { %398 = vmatpush.msra.mxu2 %v203_v4  ;;  %399 = vmatpush.msra.mxu3 %v203_v4 }
  0x16   : > { %245 = vmatpush.msra.mxu0 %v203_v4  ;;  %397 = vmatpush.msra.mxu1 %v203_v4 }
  0x17   : > { %401 = vmatpush.msra.mxu2 %v202_v5  ;;  %402 = vmatpush.msra.mxu3 %v202_v5 }
  0x18   : > { %246 = vmatpush.msra.mxu0 %v202_v5  ;;  %400 = vmatpush.msra.mxu1 %v202_v5 }
  0x19   : > { %404 = vmatpush.msra.mxu2 %v201_v6  ;;  %405 = vmatpush.msra.mxu3 %v201_v6 }
  0x1a   : > { %247 = vmatpush.msra.mxu0 %v201_v6  ;;  %403 = vmatpush.msra.mxu1 %v201_v6 }
  0x1b   : > { %407 = vmatpush.msra.mxu2 %v200_v7  ;;  %408 = vmatpush.msra.mxu3 %v200_v7 }
  0x1c   : > { %379 = vmatmul.msk.f32.vlgmr.msra.gmra.mxu2 %vm208_vm0, %v196_v8  ;;  %381 = vmatmul.msk.f32.vlgmr.msra.gmra.mxu3 %vm208_vm0, %v198_v9 }
  0x1d   : > { %248 = vmatpush.msra.mxu0 %v200_v7  ;;  %406 = vmatpush.msra.mxu1 %v200_v7 }
  0x1e   : > { %375 = vmatmul.msk.f32.vlgmr.msra.gmra.mxu0 %vm208_vm0, %v192_v10  ;;  %377 = vmatmul.msk.f32.vlgmr.msra.gmra.mxu1 %vm208_vm0, %v194_v11 }
  0x24   : > { %380 = vmatmul.msk.f32.gmra.mxu2 %vm208_vm0, %v197_v12  ;;  %382 = vmatmul.msk.f32.gmra.mxu3 %vm208_vm0, %v199_v13 }
  0x26   : > { %376 = vmatmul.msk.f32.gmra.mxu0 %vm208_vm0, %v193_v14  ;;  %378 = vmatmul.msk.f32.gmra.mxu1 %vm208_vm0, %v195_v15 }
  0x9b   : > { %v250_v16 = vpop.f32.mrf.mxu0  ;;  %v256_v17 = vpop.f32.mrf.mxu1 }
  0x9c   : > { %274 = vst [vmem:[%s190_s8] sm:$0xff] %v250_v16 }
  0x9d   : > { %276 = vst [vmem:[%s190_s8 + $0x10] sm:$0xff] %v256_v17 }
  0x9f   : > { %v262_v18 = vpop.f32.mrf.mxu2  ;;  %v268_v19 = vpop.f32.mrf.mxu3 }
  0xa0   : > { %278 = vst [vmem:[%s190_s8 + $0x20] sm:$0xff] %v262_v18 }
  0xa1   : > { %280 = vst [vmem:[%s190_s8 + $0x30] sm:$0xff] %v268_v19 }
  0xa3   : > { %v253_v20 = vpop.f32.mrf.mxu0  ;;  %v259_v21 = vpop.f32.mrf.mxu1 }
  0xa4   : > { %275 = vst [vmem:[%s190_s8 + $0x8] sm:$0xff] %v253_v20 }
  0xa5   : > { %277 = vst [vmem:[%s190_s8 + $0x18] sm:$0xff] %v259_v21 }
  0xa7   : > { %v265_v22 = vpop.f32.mrf.mxu2  ;;  %v271_v23 = vpop.f32.mrf.mxu3 }
  0xa8   : > { %279 = vst [vmem:[%s190_s8 + $0x28] sm:$0xff] %v265_v22 }
  0xa9   : > { %281 = vst [vmem:[%s190_s8 + $0x38] sm:$0xff] %v271_v23 }
  0xaa PF: > { %s12_s11 = sadd.s32 1, %s455_s11   ;;  %s547_s9 = smov %s451_s10 }
  0xab   : > { %p9_p5 = scmp.ge.s32.totalorder %s12_s11, 4   ;;  %s548_s10 = smov %s550_s12 }
  0xad   :  { %11 = sbr.rel (!%p9_p5) target bundleno = 2 (0x2), region = 61 }

</bundles_post_ra>
